<compile_context>
chip_gen: v7x
topology: tpu7x:2x2x1
jax: 0.10.0
libtpu: 0.0.40
codegen_flags: <defaults>
</compile_context>

<pallas_src>
import functools

import jax
import jax.numpy as jnp
from jax.experimental import pallas as pl
from jax.experimental.pallas import tpu as pltpu


def _round_up(x, m):
    return ((x + m - 1) // m) * m


def _ts_mean_kernel(x_ref, w_ref, o_ref, *, band_stride, kb, inv_window):
    # x_ref: (tm, S_x) row tile, resident across the (inner) T-tile grid axis.
    # w_ref: (kb, tn) banded 0/1 weights, identical for every grid point.
    # o_ref: (tm, tn) lane-dense output tile.
    j = pl.program_id(1)
    start = pl.multiple_of(j * band_stride, band_stride)  # multiple of 128
    band = x_ref[:, pl.ds(start, kb)]
    acc = jnp.dot(band, w_ref[...], preferred_element_type=jnp.float32)
    o_ref[...] = (acc * inv_window).astype(o_ref.dtype)


def ts_mean(x, window, stride, *, row_tile=256, col_tile=256):
    """Pallas implementation of TsMean.forward.

    Args:
      x: (B, F, S) array.
      window: the `min` window length from the PyTorch module.
      stride: stride between window starts.
    Returns:
      (B, F, T) float32 array with T = (S - window)//stride + 1.
    """
    B, F, S = x.shape
    if window < 1 or stride < 1:
        raise ValueError("window and stride must be >= 1")
    T = (S - window) // stride + 1
    if T < 1:
        raise ValueError(f"seq_length={S} too short for window={window}")

    rows = B * F
    # Keep native floating dtype (no f32 upcast of bf16); promote ints to f32.
    if not jnp.issubdtype(x.dtype, jnp.floating):
        x = x.astype(jnp.float32)
    xdt = x.dtype
    xb = jnp.dtype(xdt).itemsize

    # ---- tile sizes -------------------------------------------------------
    tn = min(_round_up(col_tile, 128), _round_up(T, 128))  # lane-dense T tile
    T_pad = _round_up(T, tn)
    n_tj = T_pad // tn

    kb = _round_up(window + (tn - 1) * stride, 128)  # contraction band width
    band_stride = tn * stride                        # band start step (mult of 128)

    # Columns of x needed so every band slice stays in bounds (zero-padded).
    S_x = _round_up(max(S, (n_tj - 1) * band_stride + kb), 128)

    tm = min(_round_up(row_tile, 8), _round_up(rows, 8))

    def vmem_bytes(tm_):  # double-buffered working set
        return 2 * (tm_ * S_x * xb + kb * tn * xb + tm_ * tn * 4)

    budget = 40 * 1024 * 1024
    while tm > 8 and vmem_bytes(tm) > budget:
        tm = max(8, _round_up(tm // 2, 8))
    nrows = _round_up(rows, tm)

    # ---- operands ---------------------------------------------------------
    x2 = x.reshape(rows, S)
    x2 = jnp.pad(x2, ((0, nrows - rows), (0, S_x - S)))

    # Banded 0/1 weights (shift-invariant across T tiles); 1/window is applied
    # post-matmul in f32 so the mean stays exact with bf16 operands too.
    s_idx = jnp.arange(kb)[:, None]
    t_idx = jnp.arange(tn)[None, :]
    w = ((s_idx >= t_idx * stride) & (s_idx < t_idx * stride + window)).astype(xdt)

    kernel = functools.partial(
        _ts_mean_kernel,
        band_stride=band_stride,
        kb=kb,
        inv_window=1.0 / window,
    )

    cost = pl.CostEstimate(
        flops=2 * rows * T * window,
        transcendentals=0,
        bytes_accessed=nrows * S_x * xb + kb * tn * xb + nrows * T_pad * 4,
    )

    out = pl.pallas_call(
        kernel,
        out_shape=jax.ShapeDtypeStruct((nrows, T_pad), jnp.float32),
        grid_spec=pltpu.PrefetchScalarGridSpec(
            num_scalar_prefetch=0,
            grid=(nrows // tm, n_tj),
            in_specs=[
                # Row tile of x; block index constant over j => fetched once
                # per row tile and kept resident while all T tiles are made.
                pl.BlockSpec((tm, S_x), lambda i, j: (i, 0)),
                # Tiny banded weight tile, same block for every grid point.
                pl.BlockSpec((kb, tn), lambda i, j: (0, 0)),
            ],
            out_specs=pl.BlockSpec((tm, tn), lambda i, j: (i, j)),
        ),
        compiler_params=pltpu.CompilerParams(
            dimension_semantics=("parallel", "arbitrary"),
            vmem_limit_bytes=int(
                min(56 * 1024 * 1024,
                    max(vmem_bytes(tm) + 8 * 1024 * 1024, 32 * 1024 * 1024))
            ),
        ),
        cost_estimate=cost,
    )(x2, w)

    # Module contract (torch.zeros default): float32 output.
    return out[:rows, :T].reshape(B, F, T)


def ts_mean_reference(x, window, stride):
    B, F, S = x.shape
    T = (S - window) // stride + 1
    cols = [
        jnp.mean(x[:, :, t * stride: t * stride + window].astype(jnp.float32),
                 axis=-1)
        for t in range(T)
    ]
    return jnp.stack(cols, axis=-1)


if __name__ == "__main__":
    # Module hyper-parameters (TsMean(min, stride)).
    window = 4   # "min" in the PyTorch module
    stride = 2

    B, F, S = 2, 4, 16  # batch, num_features, seq_length
    key = jax.random.PRNGKey(0)
    x = jax.random.normal(key, (B, F, S), dtype=jnp.float32)

    out = jax.block_until_ready(ts_mean(x, window, stride))
    ref = ts_mean_reference(x, window, stride)

    assert out.shape == ref.shape, (out.shape, ref.shape)
    assert out.dtype == jnp.float32, out.dtype
    assert jnp.allclose(out, ref, atol=1e-5, rtol=1e-5), "mismatch vs reference"

    print("KERNEL_OK")
</pallas_src>

<mosaic_0001>
module attributes {stable_mosaic.version = 11 : i64} {
  func.func @_ts_mean_kernel(%arg0: i32, %arg1: i32, %arg2: memref<8x384xf32, #tpu.memory_space<vmem>>, %arg3: memref<384x128xf32, #tpu.memory_space<vmem>>, %arg4: memref<8x128xf32, #tpu.memory_space<vmem>>) attributes {dimension_semantics = [#tpu.dimension_semantics<parallel>, #tpu.dimension_semantics<arbitrary>], iteration_bounds = array<i64: 1, 1>, scalar_prefetch = 0 : i64, scratch_operands = 0 : i64, tpu.core_type = #tpu.core_type<tc>, window_params = [{transform_indices = @transform_0, window_bounds = array<i64: 8, 384>}, {pipeline_mode = #tpu.pipeline_mode<synchronous>, transform_indices = @transform_1, window_bounds = array<i64: 384, 128>}, {transform_indices = @transform_2, window_bounds = array<i64: 8, 128>}]} {
    %c256_i32 = arith.constant 256 : i32
    %0 = arith.muli %arg1, %c256_i32 : i32
    %1 = tpu.assume_multiple %0, 256 : i32
    %c0 = arith.constant 0 : index
    %2 = arith.index_cast %1 : i32 to index
    %3 = vector.load %arg2[%c0, %2] : memref<8x384xf32, #tpu.memory_space<vmem>>, vector<8x384xf32>
    %c0_0 = arith.constant 0 : index
    %c0_1 = arith.constant 0 : index
    %4 = vector.load %arg3[%c0_0, %c0_1] : memref<384x128xf32, #tpu.memory_space<vmem>>, vector<384x128xf32>
    %cst = arith.constant dense<0.000000e+00> : vector<8x128xf32>
    %5 = tpu.matmul %3, %4, %cst {dimension_numbers = #tpu.dot_dimension_numbers<[1], [0], [0], [1], [0, 0, 1, 1], [], []>} : vector<8x384xf32>, vector<384x128xf32>, vector<8x128xf32> -> vector<8x128xf32>
    %cst_2 = arith.constant 2.500000e-01 : f32
    %6 = vector.broadcast %cst_2 : f32 to vector<8x128xf32>
    %7 = arith.mulf %5, %6 : vector<8x128xf32>
    %c0_3 = arith.constant 0 : index
    %c0_4 = arith.constant 0 : index
    %8 = vector.load %arg4[%c0_3, %c0_4] : memref<8x128xf32, #tpu.memory_space<vmem>>, vector<8x128xf32>
    tpu.vector_store %arg4[%c0_3, %c0_4], %7 {strides = array<i32>} : memref<8x128xf32, #tpu.memory_space<vmem>>, vector<8x128xf32>,
    return
  }
  func.func @transform_0(%arg0: i32, %arg1: i32) -> (i32, i32) {
    %c0_i32 = arith.constant 0 : i32
    %c0_i32_0 = arith.constant 0 : i32
    return %arg0, %c0_i32 : i32, i32
  }
  func.func @transform_1(%arg0: i32, %arg1: i32) -> (i32, i32) {
    %c0_i32 = arith.constant 0 : i32
    %c0_i32_0 = arith.constant 0 : i32
    %c0_i32_1 = arith.constant 0 : i32
    return %c0_i32, %c0_i32_0 : i32, i32
  }
  func.func @transform_2(%arg0: i32, %arg1: i32) -> (i32, i32) {
    %c0_i32 = arith.constant 0 : i32
    return %arg0, %arg1 : i32, i32
  }
}

</mosaic_0001>

<bundles_post_ra>
// kernel: tpu_custom_call.1
= control target key start
LH: loop header
LB: loop body
LE: loop exit
PB: predicated region body
PF: predicated region fallthrough
CT: control target
= control target key end

     0   :  { %7 = vsyncpa [#allocation3], 0  ;;  %s551_s0 = inlined_call_operand.hbm [shape: f32[8,384], index: 0, kind: input, shape index: {}]   ;;  %s552_s1 = inlined_call_operand.hbm [shape: f32[384,128], index: 1, kind: input, shape index: {}]   ;;  %s553_s2 = inlined_call_operand.hbm [shape: f32[8,128], index: 2, kind: output, shape index: {}]  }
   0x1   :  { %8 = vsyncpa [#allocation6], 0 }
   0x2   :  { %9 = vsyncpa [#allocation4], 0  ;;  %s477_s9 = smov [#allocation2]   ;;  %s478_s11 = smov [#allocation5]  }
   0x3   :  { %s16_s10 = sshll.u32 %s477_s9, 4  ;;  %s25_s12 = sshll.u32 %s478_s11, 4  ;;  %s17_s10 = int_to_ptr.vmem [resolvable:$true] %s16_s10  ;;  %s500_s12 = int_to_ptr.vmem [resolvable:$true] %s25_s12 }
   0x4   :  { %s405_s15 = scalar_lea.hbm %s551_s0, 384 }
   0x5   :  { %p406_p0 = scmp.ne.s32.totalorder %s551_s0, %s405_s15  ;;  %p409_p1 = scmp.lt.u32.totalorder %s405_s15, %s551_s0 }
   0x7   :  { %p411_p2 = pnand %p409_p1, %p406_p0 }
   0x9   :  { %414 = shalt.err (!%p411_p2)
}
   0xa   :  { %s415_s20 = scalar_lea.vmem %s17_s10, 384  ;;  %p420_p4 = scmp.lt.s32.totalorder %s17_s10, %s17_s10 }
   0xb   :  { %p416_p3 = scmp.ne.s32.totalorder %s17_s10, %s415_s20  ;;  %p421_p5 = scmp.lt.s32.totalorder %s415_s20, %s415_s20 }
   0xd   :  { %p422_p6 = por %p421_p5, %p420_p4 }
   0xf   :  { %p423_p7 = pnand %p422_p6, %p416_p3 }
  0x11   :  { %426 = shalt.err (!%p423_p7)
}
  0x12   :  { %19 = dma.hbm_to_vmem [thread:$0]  %s551_s0, 384, %s17_s10, [#allocation3]  }
  0x13   :  { %s427_s25 = scalar_lea.hbm %s552_s1, 6144 }
  0x14   :  { %p428_p8 = scmp.ne.s32.totalorder %s552_s1, %s427_s25  ;;  %p431_p9 = scmp.lt.u32.totalorder %s427_s25, %s552_s1 }
  0x16   :  { %p433_p10 = pnand %p431_p9, %p428_p8 }
  0x18   :  { %436 = shalt.err (!%p433_p10)
}
  0x19   :  { %s437_s30 = scalar_lea.vmem %s500_s12, 6144  ;;  %p442_p12 = scmp.lt.s32.totalorder %s500_s12, %s500_s12 }
  0x1a   :  { %p438_p11 = scmp.ne.s32.totalorder %s500_s12, %s437_s30  ;;  %p443_p13 = scmp.lt.s32.totalorder %s437_s30, %s437_s30 }
  0x1c   :  { %p444_p0 = por %p443_p13, %p442_p12 }
  0x1e   :  { %p445_p1 = pnand %p444_p0, %p438_p11 }
  0x20   :  { %448 = shalt.err (!%p445_p1)
}
  0x21   :  { %s479_s0 = smov 128   ;;  %s480_s3 = smov 8  }
  0x22   :  { %31 = dma.hbm_to_vmem [thread:$0]  %s552_s1, 6144, %s500_s12, [#allocation6], %s479_s0, %s479_s0, %s480_s3  }
  0x23   :  { %471 = dma.done.wait [#allocation3], 384  }
  0x24   :  { %472 = vsyncadd [#allocation3], 4294966912 }
  0x25   :  { %473 = dma.done.wait [#allocation6], 6144  }
  0x26   :  { %474 = vsyncadd [#allocation6], 4294961152  ;;  %v481_v0 = vmov 0.0|0.0   ;;  %vm482_vm0 = vmmov 0   ;;  %v483_v1 = vmov 0.0   ;;  %v62_v2 = vld [vmem:[#allocation5 + $0x80] sm:$0xff] }
  0x27   :  { %373 = vmatprep.subr.bf16.mxu1 %v481_v0  ;;  %338 = vmatprep.mubr.msk.f32.mxu1 %vm482_vm0, %v483_v1  ;;  %v63_v3 = vld [vmem:[#allocation5 + $0x88] sm:$0xff]  ;;  %v46_v4 = vld [vmem:[#allocation5] sm:$0xff]  ;;  %v64_v11 = vld [vmem:[#allocation5 + $0x90] sm:$0xff]  ;;  %s484_s1 = smov [#allocation7]  }
  0x28   :  { %v341_v5 = vpack.c.bf16 %v63_v3, %v62_v2  ;;  %v47_v6 = vld [vmem:[#allocation5 + $0x8] sm:$0xff]  ;;  %v78_v7 = vld [vmem:[#allocation5 + $0x100] sm:$0xff]  ;;  %v65_v12 = vld [vmem:[#allocation5 + $0x98] sm:$0xff]  ;;  %s242_s6 = sshll.u32 %s484_s1, 4  ;;  %s243_s6 = int_to_ptr.vmem [resolvable:$true] %s242_s6 }
  0x29   :  { %v79_v8 = vld [vmem:[#allocation5 + $0x108] sm:$0xff]  ;;  %v343_v9 = vpack.c.bf16 %v47_v6, %v46_v4  ;;  %v48_v13 = vld [vmem:[#allocation5 + $0x10] sm:$0xff]  ;;  %v345_v14 = vpack.c.bf16 %v65_v12, %v64_v11  ;;  %v49_v15 = vld [vmem:[#allocation5 + $0x18] sm:$0xff]  ;;  %s449_s7 = scalar_lea.vmem %s243_s6, 128  ;;  %p454_p3 = scmp.lt.s32.totalorder %s243_s6, %s243_s6 }
  0x2a   :  { %v374_v10 = vpack.c.bf16 %v79_v8, %v78_v7  ;;  %342 = vmatprep.subr.bf16.mxu0 %v341_v5  ;;  %v80_v16 = vld [vmem:[#allocation5 + $0x110] sm:$0xff]  ;;  %v81_v17 = vld [vmem:[#allocation5 + $0x118] sm:$0xff]  ;;  %v347_v18 = vpack.c.bf16 %v49_v15, %v48_v13  ;;  %v66_v20 = vld [vmem:[#allocation5 + $0xa0] sm:$0xff]  ;;  %p450_p2 = scmp.ne.s32.totalorder %s243_s6, %s449_s7  ;;  %p455_p4 = scmp.lt.s32.totalorder %s449_s7, %s449_s7 }
  0x2b   :  { %344 = vmatpush3.bf16.msra.mxu0 %v343_v9  ;;  %v377_v19 = vpack.c.bf16 %v81_v17, %v80_v16  ;;  %v67_v21 = vld [vmem:[#allocation5 + $0xa8] sm:$0xff]  ;;  %v50_v22 = vld [vmem:[#allocation5 + $0x20] sm:$0xff]  ;;  %v68_v27 = vld [vmem:[#allocation5 + $0xb0] sm:$0xff] }
  0x2c   :  { %375 = vmatpush3.bf16.msra.mxu1 %v374_v10  ;;  %346 = vmatprep.subr.bf16.mxu0 %v345_v14  ;;  %v349_v23 = vpack.c.bf16 %v67_v21, %v66_v20  ;;  %v51_v24 = vld [vmem:[#allocation5 + $0x28] sm:$0xff]  ;;  %v82_v25 = vld [vmem:[#allocation5 + $0x120] sm:$0xff]  ;;  %v69_v28 = vld [vmem:[#allocation5 + $0xb8] sm:$0xff]  ;;  %p456_p5 = por %p455_p4, %p454_p3 }
  0x2d   :  { %376 = vmatprep.subr.bf16.mxu1 %v481_v0  ;;  %v83_v26 = vld [vmem:[#allocation5 + $0x128] sm:$0xff]  ;;  %v351_v29 = vpack.c.bf16 %v51_v24, %v50_v22  ;;  %v52_v31 = vld [vmem:[#allocation5 + $0x30] sm:$0xff]  ;;  %v353_v32 = vpack.c.bf16 %v69_v28, %v68_v27  ;;  %v53_v33 = vld [vmem:[#allocation5 + $0x38] sm:$0xff] }
  0x2e   :  { %v380_v30 = vpack.c.bf16 %v83_v26, %v82_v25  ;;  %v84_v34 = vld [vmem:[#allocation5 + $0x130] sm:$0xff]  ;;  %v85_v35 = vld [vmem:[#allocation5 + $0x138] sm:$0xff]  ;;  %v70_v36 = vld [vmem:[#allocation5 + $0xc0] sm:$0xff]  ;;  %v355_v38 = vpack.c.bf16 %v53_v33, %v52_v31  ;;  %p457_p6 = pnand %p456_p5, %p450_p2 }
  0x2f   :  { %348 = vmatpush3.bf16.msra.mxu0 %v347_v18  ;;  %v71_v37 = vld [vmem:[#allocation5 + $0xc8] sm:$0xff]  ;;  %v383_v39 = vpack.c.bf16 %v85_v35, %v84_v34  ;;  %v54_v40 = vld [vmem:[#allocation5 + $0x40] sm:$0xff]  ;;  %v72_v45 = vld [vmem:[#allocation5 + $0xd0] sm:$0xff] }
  0x30   :  { %378 = vmatpush3.bf16.msra.mxu1 %v377_v19  ;;  %350 = vmatprep.subr.bf16.mxu0 %v349_v23  ;;  %v357_v41 = vpack.c.bf16 %v71_v37, %v70_v36  ;;  %v55_v42 = vld [vmem:[#allocation5 + $0x48] sm:$0xff]  ;;  %v86_v43 = vld [vmem:[#allocation5 + $0x140] sm:$0xff]  ;;  %v73_v46 = vld [vmem:[#allocation5 + $0xd8] sm:$0xff] }
  0x31   :  { %379 = vmatprep.subr.bf16.mxu1 %v481_v0  ;;  %v87_v44 = vld [vmem:[#allocation5 + $0x148] sm:$0xff]  ;;  %v44_v47 = vld [vmem:[#allocation2 + $0x8] sm:$0xff]  ;;  %v359_v48 = vpack.c.bf16 %v55_v42, %v54_v40  ;;  %v361_v51 = vpack.c.bf16 %v73_v46, %v72_v45  ;;  %v57_v52 = vld [vmem:[#allocation5 + $0x58] sm:$0xff] }
  0x32   :  { %v386_v49 = vpack.c.bf16 %v87_v44, %v86_v43  ;;  %v56_v50 = vld [vmem:[#allocation5 + $0x50] sm:$0xff]  ;;  %v89_v54 = vld [vmem:[#allocation5 + $0x158] sm:$0xff]  ;;  %v74_v55 = vld [vmem:[#allocation5 + $0xe0] sm:$0xff]  ;;  %158 = vmatprep.mubr.f32.mxu0 %v44_v47 }
  0x33   :  { %352 = vmatpush3.bf16.msra.mxu0 %v351_v29  ;;  %v88_v53 = vld [vmem:[#allocation5 + $0x150] sm:$0xff]  ;;  %v75_v56 = vld [vmem:[#allocation5 + $0xe8] sm:$0xff]  ;;  %v363_v57 = vpack.c.bf16 %v57_v52, %v56_v50  ;;  %v58_v59 = vld [vmem:[#allocation5 + $0x60] sm:$0xff] }
  0x34   :  { %381 = vmatpush3.bf16.msra.mxu1 %v380_v30  ;;  %354 = vmatprep.subr.bf16.mxu0 %v353_v32  ;;  %v389_v58 = vpack.c.bf16 %v89_v54, %v88_v53  ;;  %v365_v60 = vpack.c.bf16 %v75_v56, %v74_v55  ;;  %v59_v61 = vld [vmem:[#allocation5 + $0x68] sm:$0xff]  ;;  %v90_v62 = vld [vmem:[#allocation5 + $0x160] sm:$0xff]  ;;  %v76_v1 = vld [vmem:[#allocation5 + $0xf0] sm:$0xff] }
  0x35   :  { %382 = vmatprep.subr.bf16.mxu1 %v481_v0  ;;  %v91_v63 = vld [vmem:[#allocation5 + $0x168] sm:$0xff]  ;;  %v77_v2 = vld [vmem:[#allocation5 + $0xf8] sm:$0xff]  ;;  %v367_v3 = vpack.c.bf16 %v59_v61, %v58_v59  ;;  %v60_v5 = vld [vmem:[#allocation5 + $0x70] sm:$0xff] }
  0x36   :  { %v392_v4 = vpack.c.bf16 %v91_v63, %v90_v62  ;;  %v369_v6 = vpack.c.bf16 %v77_v2, %v76_v1  ;;  %v61_v7 = vld [vmem:[#allocation5 + $0x78] sm:$0xff]  ;;  %v92_v8 = vld [vmem:[#allocation5 + $0x170] sm:$0xff]  ;;  %v43_v12 = vld [vmem:[#allocation2] sm:$0xff] }
  0x37   :  { %356 = vmatpush3.bf16.msra.mxu0 %v355_v38  ;;  %v93_v9 = vld [vmem:[#allocation5 + $0x178] sm:$0xff]  ;;  %v371_v10 = vpack.c.bf16 %v61_v7, %v60_v5 }
  0x38   :  { %384 = vmatpush3.bf16.msra.mxu1 %v383_v39  ;;  %358 = vmatprep.subr.bf16.mxu0 %v357_v41  ;;  %v395_v11 = vpack.c.bf16 %v93_v9, %v92_v8  ;;  %v45_v13 = vld [vmem:[#allocation2 + $0x10] sm:$0xff] }
  0x39   :  { %385 = vmatprep.subr.bf16.mxu1 %v481_v0 }
  0x3b   :  { %360 = vmatpush3.bf16.msra.mxu0 %v359_v48 }
  0x3c   :  { %387 = vmatpush3.bf16.msra.mxu1 %v386_v49  ;;  %362 = vmatprep.subr.bf16.mxu0 %v361_v51 }
  0x3d   :  { %388 = vmatprep.subr.bf16.mxu1 %v481_v0 }
  0x3f   :  { %364 = vmatpush3.bf16.msra.mxu0 %v363_v57 }
  0x40   :  { %390 = vmatpush3.bf16.msra.mxu1 %v389_v58  ;;  %366 = vmatprep.subr.bf16.mxu0 %v365_v60 }
  0x41   :  { %391 = vmatprep.subr.bf16.mxu1 %v481_v0 }
  0x43   :  { %368 = vmatpush3.bf16.msra.mxu0 %v367_v3 }
  0x44   :  { %393 = vmatpush3.bf16.msra.mxu1 %v392_v4  ;;  %370 = vmatprep.subr.bf16.mxu0 %v369_v6 }
  0x45   :  { %394 = vmatprep.subr.bf16.mxu1 %v481_v0 }
  0x47   :  { %372 = vmatpush3.bf16.msra.mxu0 %v371_v10 }
  0x48   :  { %396 = vmatpush3.bf16.msra.mxu1 %v395_v11 }
  0x4a   :  { %159 = vmatmul.mubr.f32.vlgmr.msra.gmra.mrb[0].mxu0 %v43_v12 }
  0x4b   :  { %339 = vmatmul.mubr.f32.vlgmr.msra.gmra.mrb[0].mxu1 %v45_v13 }
 0x11d   :  { %v286_v14 = vpop.f32.mrb[0].mxu0 }
 0x11e   :  { %v230_v15 = vpop.f32.mrb[0].mxu1  ;;  %v287_v16 = vpop.f32.mrb[1].mxu0 }
 0x11f   :  { %v340_v17 = vpop.f32.mrb[1].mxu1  ;;  %v288_v18 = vadd.f32 %v287_v16, %v286_v14 }
 0x121   :  { %v231_v19 = vadd.f32 %v288_v18, %v230_v15 }
 0x123   :  { %v234_v20 = vmul.f32 0.25, %v231_v19 }
 0x125   :  { %235 = vst [vmem:[#allocation7] sm:$0xff] %v234_v20 }
 0x126   :  { %460 = shalt.err (!%p457_p6)
}
 0x127   :  { %s461_s10 = scalar_lea.hbm %s553_s2, 128 }
 0x128   :  { %p462_p7 = scmp.ne.s32.totalorder %s553_s2, %s461_s10  ;;  %p465_p8 = scmp.lt.u32.totalorder %s461_s10, %s553_s2 }
 0x12a   :  { %p467_p9 = pnand %p465_p8, %p462_p7 }
 0x12c   :  { %470 = shalt.err (!%p467_p9)
}
 0x12d   :  { %245 = dma.vmem_to_hbm [thread:$0]  %s243_s6, 128, %s553_s2, [#allocation4]  }
 0x12e   :  { %475 = dma.done.wait [#allocation4], 128  }
 0x12f   :  { %476 = vsyncadd [#allocation4], 4294967168 }
 0x130   :  { %249 = vsyncpa [#allocation3], 1 }
 0x131   :  { %250 = vsyncpa [#allocation6], 1 }
 0x132   :  { %251 = vsyncpa [#allocation4], 1 }

</bundles_post_ra>
